<compile_context>
chip_gen: v5e
topology: v5e:2x2
jax: 0.10.0
libtpu: 0.0.40
codegen_flags: <defaults>
</compile_context>

<pallas_src>
import jax
import jax.numpy as jnp
from jax.experimental import pallas as pl
from jax.experimental.pallas import tpu as pltpu

# Rows per batch tile. 512 rows * n_days * 4B double-buffered stays at a few
# MiB for typical n_days, comfortably inside the scoped VMEM limits of
# v5e (16 MiB), v6e (32 MiB) and v7x (32 MiB).
_TM_MAX = 512


def _make_kernel(inv_n: float):
    def _averaging_kernel(x_ref, o_ref):
        # f32 accumulation (also avoids bf16 VPU lowering issues on v5e).
        s = jnp.sum(x_ref[...].astype(jnp.float32), axis=-1, keepdims=True)
        o_ref[...] = (s * inv_n).astype(o_ref.dtype)

    return _averaging_kernel


def averaging(x: jax.Array, n_days: int) -> jax.Array:
    """Equivalent of Averaging(n_days)(x) for x of shape (batch, n_days)."""
    assert x.shape[-1] == n_days
    batch = x.shape[0]

    # Tile the batch axis. If the whole batch is small, use it as one tile
    # (block dim == full array dim satisfies the layout constraint); otherwise
    # use a multiple-of-8 tile and let Pallas handle the partial last block
    # (padded rows only affect padded output rows, which are discarded).
    tm = batch if batch <= _TM_MAX else _TM_MAX
    grid = (pl.cdiv(batch, tm),)

    inv_n = 1.0 / float(n_days)

    return pl.pallas_call(
        _make_kernel(inv_n),
        out_shape=jax.ShapeDtypeStruct((batch, 1), x.dtype),
        grid_spec=pl.GridSpec(
            grid=grid,
            in_specs=[pl.BlockSpec((tm, n_days), lambda i: (i, 0))],
            out_specs=pl.BlockSpec((tm, 1), lambda i: (i, 0)),
        ),
        compiler_params=pltpu.CompilerParams(
            # Batch tiles are independent -> shard across TCs on v7x.
            dimension_semantics=("parallel",),
        ),
        cost_estimate=pl.CostEstimate(
            flops=2 * batch * n_days,
            transcendentals=0,
            bytes_accessed=(batch * n_days + batch) * x.dtype.itemsize,
        ),
    )(x)


if __name__ == "__main__":
    n_days = 32
    batch = 8
    key = jax.random.PRNGKey(0)
    x = jax.random.normal(key, (batch, n_days), dtype=jnp.float32)

    out = averaging(x, n_days)
    out = jax.block_until_ready(out)

    # Reference check: row-wise mean (== x @ (ones/n_days).T).
    ref = jnp.mean(x, axis=-1, keepdims=True)
    assert out.shape == (batch, 1)
    assert jnp.allclose(out, ref, atol=1e-5, rtol=1e-5)

    print("KERNEL_OK")
</pallas_src>

<mosaic_0001>
module attributes {stable_mosaic.version = 11 : i64} {
  func.func @_averaging_kernel(%arg0: i32, %arg1: memref<8x32xf32, #tpu.memory_space<vmem>>, %arg2: memref<8x1xf32, #tpu.memory_space<vmem>>) attributes {dimension_semantics = [#tpu.dimension_semantics<parallel>], iteration_bounds = array<i64: 1>, scalar_prefetch = 0 : i64, scratch_operands = 0 : i64, tpu.core_type = #tpu.core_type<tc>, window_params = [{transform_indices = @transform_0, window_bounds = array<i64: 8, 32>}, {transform_indices = @transform_1, window_bounds = array<i64: 8, 1>}]} {
    %c0 = arith.constant 0 : index
    %c0_0 = arith.constant 0 : index
    %0 = vector.load %arg1[%c0, %c0_0] : memref<8x32xf32, #tpu.memory_space<vmem>>, vector<8x32xf32>
    %cst = arith.constant dense<0.000000e+00> : vector<8xf32>
    %1 = vector.multi_reduction <add>, %0, %cst [1] : vector<8x32xf32> to vector<8xf32>
    %2 = vector.shape_cast %1 : vector<8xf32> to vector<8x1xf32>
    %cst_1 = arith.constant 3.125000e-02 : f32
    %3 = vector.broadcast %cst_1 : f32 to vector<8x1xf32>
    %4 = arith.mulf %2, %3 : vector<8x1xf32>
    %c0_2 = arith.constant 0 : index
    %c0_3 = arith.constant 0 : index
    %5 = vector.load %arg2[%c0_2, %c0_3] : memref<8x1xf32, #tpu.memory_space<vmem>>, vector<8x1xf32>
    tpu.vector_store %arg2[%c0_2, %c0_3], %4 {strides = array<i32>} : memref<8x1xf32, #tpu.memory_space<vmem>>, vector<8x1xf32>,
    return
  }
  func.func @transform_0(%arg0: i32) -> (i32, i32) {
    %c0_i32 = arith.constant 0 : i32
    %c0_i32_0 = arith.constant 0 : i32
    return %arg0, %c0_i32 : i32, i32
  }
  func.func @transform_1(%arg0: i32) -> (i32, i32) {
    %c0_i32 = arith.constant 0 : i32
    %c0_i32_0 = arith.constant 0 : i32
    return %arg0, %c0_i32 : i32, i32
  }
}

</mosaic_0001>

<bundles_post_ra>
// kernel: tpu_custom_call.1
= control target key start
LH: loop header
LB: loop body
LE: loop exit
PB: predicated region body
PF: predicated region fallthrough
CT: control target
= control target key end

     0   :  { %6 = vsyncpa [#allocation3], 0  ;;  %s62_s9 = smov [#allocation2]   ;;  %s79_s0 = inlined_call_operand.hbm [shape: f32[8,32], index: 0, kind: input, shape index: {}]   ;;  %s80_s1 = inlined_call_operand.vmem [shape: f32[8,1], index: 1, kind: output, shape index: {}]  }
   0x1   :  { %s12_s8 = sshll.u32 %s79_s0, 4  ;;  %s14_s10 = sshll.u32 %s62_s9, 4  ;;  %s13_s8 = int_to_ptr.hbm [resolvable:$true] %s12_s8  ;;  %s15_s10 = int_to_ptr.vmem [resolvable:$true] %s14_s10 }
   0x2   :  { %17 = dma.hbm_to_vmem [thread:$0]  %s13_s8, 128, %s15_s10, [#allocation3]  }
   0x3   :  { %60 = dma.done.wait [#allocation3], 128  }
   0x4   :  { %61 = vsyncadd [#allocation3], 4294967168  ;;  %vm23_vm0 = vcmask 261120   ;;  %v22_v0 = vld [vmem:[#allocation2] sm:$0xff]  ;;  %vm28_vm1 = vcmask 7168  }
   0x5   :  { %v24_v1 = vsel %vm23_vm0, %v22_v0, 0.0 }
   0x6   :  { %25 = vadd.xlane.f32.xlu0 %v24_v1 }
  0x79   :  { %v26_v2 = vpop.xlane.xlu0 %25 }
  0x7a   :  { %v27_v3 = vmul.f32 0.03125, %v26_v2 }
  0x7c   :  { %29 = vst.msk [vmem:[%s80_s1] sm:$0xff] %vm28_vm1, %v27_v3 }
  0x7d   :  { %34 = vsyncpa [#allocation3], 1 }

</bundles_post_ra>
